<compile_context>
chip_gen: v7x
topology: tpu7x:2x2x1
jax: 0.10.0
libtpu: 0.0.40
codegen_flags: <defaults>
</compile_context>

<pallas_src>
import functools

import jax
import jax.numpy as jnp
from jax.experimental import pallas as pl
from jax.experimental.pallas import tpu as pltpu


# ----------------------------------------------------------------------------- kernel body

def _make_fused_mlp_kernel(n_layers_total: int):
    """Fused MLP kernel: refs = (x, W0, b0, W1, b1, ..., W_{L-1}, b_{L-1}, out)."""

    def kernel(*refs):
        x_ref = refs[0]
        out_ref = refs[-1]
        wb_refs = refs[1:-1]

        x = x_ref[...]  # (TB, in_dim) f32
        for li in range(n_layers_total):
            w = wb_refs[2 * li][...]          # (fan_in, fan_out)
            b = wb_refs[2 * li + 1][...]      # (1, fan_out)
            y = jnp.dot(x, w, preferred_element_type=jnp.float32) + b
            if li < n_layers_total - 1:       # all but the last layer: ReLU (+ dropout==identity)
                y = jnp.maximum(y, 0.0)
            x = y
        out_ref[...] = x.astype(out_ref.dtype)

    return kernel


# ----------------------------------------------------------------------------- wrapper

def _cost_estimate(batch, in_dim, out_dim, flat_params):
    flops = 0
    bytes_accessed = batch * in_dim * 4 + batch * out_dim * 4
    for i in range(0, len(flat_params), 2):
        w = flat_params[i]
        b = flat_params[i + 1]
        flops += 2 * batch * w.shape[0] * w.shape[1]
        bytes_accessed += w.size * w.dtype.itemsize + b.size * b.dtype.itemsize
    return pl.CostEstimate(flops=flops, transcendentals=0, bytes_accessed=bytes_accessed)


@functools.partial(jax.jit, static_argnames=("batch_tile",))
def forecasting_model_forward(x, params, *, batch_tile: int = 512):
    """Pallas implementation of Forecasting_Model.forward (inference mode).

    x: (..., in_dim) float32 (arbitrary leading dims, like nn.Linear).
    params: tuple of (W, b) with W of shape (fan_in, fan_out), b of shape (fan_out,).
    """
    x = x.astype(jnp.float32)
    in_dim = x.shape[-1]
    lead_shape = x.shape[:-1]
    x2 = x.reshape(-1, in_dim)
    B = x2.shape[0]

    n_total = len(params)
    out_dim = params[-1][0].shape[1]
    kernel = _make_fused_mlp_kernel(n_total)

    # Flatten params; biases reshaped to (1, F_out) for clean broadcasting on the lane axis.
    flat = []
    for (w, b) in params:
        flat.append(w.astype(jnp.float32))
        flat.append(b.reshape(1, -1).astype(jnp.float32))

    cost = _cost_estimate(B, in_dim, out_dim, flat)

    # Sublane-align the batch tile.
    TB = max(8, (int(batch_tile) // 8) * 8)

    if B <= TB:
        # Whole problem is one block: no grid, no double-buffering -> everything lives in VMEM
        # for the single kernel invocation.
        vmem_spec = pl.BlockSpec(memory_space=pltpu.MemorySpace.VMEM)
        out = pl.pallas_call(
            kernel,
            out_shape=jax.ShapeDtypeStruct((B, out_dim), jnp.float32),
            in_specs=[vmem_spec] * (1 + len(flat)),
            out_specs=vmem_spec,
            cost_estimate=cost,
        )(x2, *flat)
        return out.reshape(*lead_shape, out_dim)

    # ---- batch-tiled path -------------------------------------------------------------
    n_tiles = pl.cdiv(B, TB)
    B_pad = n_tiles * TB
    if B_pad != B:
        # Rows are independent; zero-padding the batch is harmless and keeps block shapes legal.
        x2 = jnp.pad(x2, ((0, B_pad - B), (0, 0)))

    in_specs = [pl.BlockSpec((TB, in_dim), lambda i: (i, 0))]
    for j in range(0, len(flat), 2):
        w, b2 = flat[j], flat[j + 1]
        # Weights/biases: same block every grid step -> stay resident in VMEM across iterations
        # (Pallas skips the redundant DMA when the block index does not change).
        in_specs.append(pl.BlockSpec(w.shape, lambda i: (0, 0)))
        in_specs.append(pl.BlockSpec(b2.shape, lambda i: (0, 0)))

    out = pl.pallas_call(
        kernel,
        out_shape=jax.ShapeDtypeStruct((B_pad, out_dim), jnp.float32),
        grid=(n_tiles,),
        in_specs=in_specs,
        out_specs=pl.BlockSpec((TB, out_dim), lambda i: (i, 0)),
        compiler_params=pltpu.CompilerParams(
            # Batch tiles are independent -> "parallel" lets v7x split them across its 2 TCs.
            dimension_semantics=("parallel",),
        ),
        cost_estimate=cost,
    )(x2, *flat)
    return out[:B].reshape(*lead_shape, out_dim)


# ----------------------------------------------------------------------------- params / reference

def init_forecasting_params(key, in_dim, hid_dim, out_dim, n_layers):
    """Deterministic parameter init matching the module's layer shapes.

    Layers: [Linear(in_dim, hid), Linear(hid, hid) * (n_layers - 1), Linear(hid, out_dim)]
    Weights stored as (fan_in, fan_out)  (== PyTorch weight.T).
    """
    dims = [in_dim] + [hid_dim] * n_layers + [out_dim]
    params = []
    for li in range(len(dims) - 1):
        fan_in, fan_out = dims[li], dims[li + 1]
        key, kw, kb = jax.random.split(key, 3)
        bound = 1.0 / jnp.sqrt(jnp.float32(fan_in))
        w = jax.random.uniform(kw, (fan_in, fan_out), jnp.float32, -bound, bound)
        b = jax.random.uniform(kb, (fan_out,), jnp.float32, -bound, bound)
        params.append((w, b))
    return tuple(params)


def reference_forward(x, params):
    """Plain-JAX reference for correctness checking (dropout = identity at eval)."""
    for (w, b) in params[:-1]:
        x = jnp.maximum(x @ w + b, 0.0)
    w, b = params[-1]
    return x @ w + b


# ----------------------------------------------------------------------------- main

if __name__ == "__main__":
    # Shapes consistent with the module's forward:
    # in_dim=16, hid_dim=32, out_dim=4, n_layers=3, dropout=0.1 (identity at eval).
    in_dim, hid_dim, out_dim, n_layers = 16, 32, 4, 3

    key = jax.random.PRNGKey(0)
    key, kx_small, kx_big, kx_3d = jax.random.split(key, 4)
    params = init_forecasting_params(key, in_dim, hid_dim, out_dim, n_layers)

    # 1) Small batch -> single-block (grid-less, fully VMEM-resident) fused path.
    batch_small = 8
    x_small = jax.random.normal(kx_small, (batch_small, in_dim), dtype=jnp.float32)
    out_small = jax.block_until_ready(forecasting_model_forward(x_small, params))
    ref_small = reference_forward(x_small, params)
    assert out_small.shape == (batch_small, out_dim)
    assert jnp.allclose(out_small, ref_small, atol=1e-5, rtol=1e-5), "small-batch mismatch vs reference"

    # 2) Larger batch -> batch-tiled fused path (grid over batch, parallel semantics,
    #    weights resident in VMEM across grid steps).  Non-multiple batch exercises padding.
    batch_big = 1200  # 3 tiles of 512 with padding on the last one
    x_big = jax.random.normal(kx_big, (batch_big, in_dim), dtype=jnp.float32)
    out_big = jax.block_until_ready(forecasting_model_forward(x_big, params))
    ref_big = reference_forward(x_big, params)
    assert out_big.shape == (batch_big, out_dim)
    assert jnp.allclose(out_big, ref_big, atol=1e-5, rtol=1e-5), "tiled-batch mismatch vs reference"

    # 3) 3-D input (leading dims flattened, like nn.Linear applied on the last axis).
    x_3d = jax.random.normal(kx_3d, (2, 6, in_dim), dtype=jnp.float32)
    out_3d = jax.block_until_ready(forecasting_model_forward(x_3d, params))
    ref_3d = reference_forward(x_3d.reshape(-1, in_dim), params).reshape(2, 6, out_dim)
    assert out_3d.shape == (2, 6, out_dim)
    assert jnp.allclose(out_3d, ref_3d, atol=1e-5, rtol=1e-5), "3-D input mismatch vs reference"

    print("KERNEL_OK")
</pallas_src>

<mosaic_0001>
module attributes {stable_mosaic.version = 11 : i64} {
  func.func @kernel(%arg0: memref<8x16xf32, #tpu.memory_space<vmem>>, %arg1: memref<16x32xf32, #tpu.memory_space<vmem>>, %arg2: memref<1x32xf32, #tpu.memory_space<vmem>>, %arg3: memref<32x32xf32, #tpu.memory_space<vmem>>, %arg4: memref<1x32xf32, #tpu.memory_space<vmem>>, %arg5: memref<32x32xf32, #tpu.memory_space<vmem>>, %arg6: memref<1x32xf32, #tpu.memory_space<vmem>>, %arg7: memref<32x4xf32, #tpu.memory_space<vmem>>, %arg8: memref<1x4xf32, #tpu.memory_space<vmem>>, %arg9: memref<8x4xf32, #tpu.memory_space<vmem>>) attributes {dimension_semantics = [], scalar_prefetch = 0 : i64, scratch_operands = 0 : i64, tpu.core_type = #tpu.core_type<tc>} {
    %c0 = arith.constant 0 : index
    %c0_0 = arith.constant 0 : index
    %0 = vector.load %arg0[%c0, %c0_0] : memref<8x16xf32, #tpu.memory_space<vmem>>, vector<8x16xf32>
    %c0_1 = arith.constant 0 : index
    %c0_2 = arith.constant 0 : index
    %1 = vector.load %arg1[%c0_1, %c0_2] : memref<16x32xf32, #tpu.memory_space<vmem>>, vector<16x32xf32>
    %c0_3 = arith.constant 0 : index
    %c0_4 = arith.constant 0 : index
    %2 = vector.load %arg2[%c0_3, %c0_4] : memref<1x32xf32, #tpu.memory_space<vmem>>, vector<1x32xf32>
    %cst = arith.constant dense<0.000000e+00> : vector<8x32xf32>
    %3 = tpu.matmul %0, %1, %cst {dimension_numbers = #tpu.dot_dimension_numbers<[1], [0], [0], [1], [0, 0, 1, 1], [], []>} : vector<8x16xf32>, vector<16x32xf32>, vector<8x32xf32> -> vector<8x32xf32>
    %4 = vector.broadcast %2 : vector<1x32xf32> to vector<8x32xf32>
    %5 = arith.addf %3, %4 : vector<8x32xf32>
    %cst_5 = arith.constant 0.000000e+00 : f32
    %6 = vector.broadcast %cst_5 : f32 to vector<8x32xf32>
    %7 = arith.maximumf %5, %6 : vector<8x32xf32>
    %c0_6 = arith.constant 0 : index
    %c0_7 = arith.constant 0 : index
    %8 = vector.load %arg3[%c0_6, %c0_7] : memref<32x32xf32, #tpu.memory_space<vmem>>, vector<32x32xf32>
    %c0_8 = arith.constant 0 : index
    %c0_9 = arith.constant 0 : index
    %9 = vector.load %arg4[%c0_8, %c0_9] : memref<1x32xf32, #tpu.memory_space<vmem>>, vector<1x32xf32>
    %cst_10 = arith.constant dense<0.000000e+00> : vector<8x32xf32>
    %10 = tpu.matmul %7, %8, %cst_10 {dimension_numbers = #tpu.dot_dimension_numbers<[1], [0], [0], [1], [0, 0, 1, 1], [], []>} : vector<8x32xf32>, vector<32x32xf32>, vector<8x32xf32> -> vector<8x32xf32>
    %11 = vector.broadcast %9 : vector<1x32xf32> to vector<8x32xf32>
    %12 = arith.addf %10, %11 : vector<8x32xf32>
    %cst_11 = arith.constant 0.000000e+00 : f32
    %13 = vector.broadcast %cst_11 : f32 to vector<8x32xf32>
    %14 = arith.maximumf %12, %13 : vector<8x32xf32>
    %c0_12 = arith.constant 0 : index
    %c0_13 = arith.constant 0 : index
    %15 = vector.load %arg5[%c0_12, %c0_13] : memref<32x32xf32, #tpu.memory_space<vmem>>, vector<32x32xf32>
    %c0_14 = arith.constant 0 : index
    %c0_15 = arith.constant 0 : index
    %16 = vector.load %arg6[%c0_14, %c0_15] : memref<1x32xf32, #tpu.memory_space<vmem>>, vector<1x32xf32>
    %cst_16 = arith.constant dense<0.000000e+00> : vector<8x32xf32>
    %17 = tpu.matmul %14, %15, %cst_16 {dimension_numbers = #tpu.dot_dimension_numbers<[1], [0], [0], [1], [0, 0, 1, 1], [], []>} : vector<8x32xf32>, vector<32x32xf32>, vector<8x32xf32> -> vector<8x32xf32>
    %18 = vector.broadcast %16 : vector<1x32xf32> to vector<8x32xf32>
    %19 = arith.addf %17, %18 : vector<8x32xf32>
    %cst_17 = arith.constant 0.000000e+00 : f32
    %20 = vector.broadcast %cst_17 : f32 to vector<8x32xf32>
    %21 = arith.maximumf %19, %20 : vector<8x32xf32>
    %c0_18 = arith.constant 0 : index
    %c0_19 = arith.constant 0 : index
    %22 = vector.load %arg7[%c0_18, %c0_19] : memref<32x4xf32, #tpu.memory_space<vmem>>, vector<32x4xf32>
    %c0_20 = arith.constant 0 : index
    %c0_21 = arith.constant 0 : index
    %23 = vector.load %arg8[%c0_20, %c0_21] : memref<1x4xf32, #tpu.memory_space<vmem>>, vector<1x4xf32>
    %cst_22 = arith.constant dense<0.000000e+00> : vector<8x4xf32>
    %24 = tpu.matmul %21, %22, %cst_22 {dimension_numbers = #tpu.dot_dimension_numbers<[1], [0], [0], [1], [0, 0, 1, 1], [], []>} : vector<8x32xf32>, vector<32x4xf32>, vector<8x4xf32> -> vector<8x4xf32>
    %25 = vector.broadcast %23 : vector<1x4xf32> to vector<8x4xf32>
    %26 = arith.addf %24, %25 : vector<8x4xf32>
    %c0_23 = arith.constant 0 : index
    %c0_24 = arith.constant 0 : index
    %27 = vector.load %arg9[%c0_23, %c0_24] : memref<8x4xf32, #tpu.memory_space<vmem>>, vector<8x4xf32>
    tpu.vector_store %arg9[%c0_23, %c0_24], %26 {strides = array<i32>} : memref<8x4xf32, #tpu.memory_space<vmem>>, vector<8x4xf32>,
    return
  }
}

</mosaic_0001>

<bundles_post_ra>
// kernel: forecasting_model_forward.1
= control target key start
LH: loop header
LB: loop body
LE: loop exit
PB: predicated region body
PF: predicated region fallthrough
CT: control target
= control target key end

     0   :  { %14 = vsyncpa [#allocation3], 0  ;;  %s694_s0 = inlined_call_operand.hbm [shape: f32[8,16], index: 0, kind: input, shape index: {}]   ;;  %s695_s1 = inlined_call_operand.hbm [shape: f32[16,32], index: 1, kind: input, shape index: {}]   ;;  %s696_s2 = inlined_call_operand.vmem [shape: f32[1,32], index: 2, kind: input, shape index: {}]   ;;  %s697_s3 = inlined_call_operand.vmem [shape: f32[32,32], index: 3, kind: input, shape index: {}]   ;;  %s698_s4 = inlined_call_operand.vmem [shape: f32[1,32], index: 4, kind: input, shape index: {}]   ;;  %s699_s5 = inlined_call_operand.vmem [shape: f32[32,32], index: 5, kind: input, shape index: {}]   ;;  %s700_s6 = inlined_call_operand.vmem [shape: f32[1,32], index: 6, kind: input, shape index: {}]   ;;  %s701_s7 = inlined_call_operand.vmem [shape: f32[32,4], index: 7, kind: input, shape index: {}]   ;;  %s702_s8 = inlined_call_operand.vmem [shape: f32[1,4], index: 8, kind: input, shape index: {}]   ;;  %s703_s9 = inlined_call_operand.vmem [shape: f32[8,4], index: 9, kind: output, shape index: {}]  }
   0x1   :  { %15 = vsyncpa [#allocation5], 0  ;;  %s548_s30 = smov [#allocation2]   ;;  %s549_s11 = smov [#allocation4]  }
   0x2   :  { %s22_s10 = sshll.u32 %s548_s30, 4  ;;  %s31_s12 = sshll.u32 %s549_s11, 4  ;;  %s23_s10 = int_to_ptr.vmem [resolvable:$true] %s22_s10  ;;  %s605_s12 = int_to_ptr.vmem [resolvable:$true] %s31_s12 }
   0x3   :  { %s500_s15 = scalar_lea.hbm %s694_s0, 128 }
   0x4   :  { %p501_p0 = scmp.ne.s32.totalorder %s694_s0, %s500_s15  ;;  %p504_p1 = scmp.lt.u32.totalorder %s500_s15, %s694_s0 }
   0x6   :  { %p506_p2 = pnand %p504_p1, %p501_p0 }
   0x8   :  { %509 = shalt.err (!%p506_p2)
}
   0x9   :  { %s510_s20 = scalar_lea.vmem %s23_s10, 128  ;;  %p515_p4 = scmp.lt.s32.totalorder %s23_s10, %s23_s10 }
   0xa   :  { %p511_p3 = scmp.ne.s32.totalorder %s23_s10, %s510_s20  ;;  %p516_p5 = scmp.lt.s32.totalorder %s510_s20, %s510_s20 }
   0xc   :  { %p517_p6 = por %p516_p5, %p515_p4 }
   0xe   :  { %p518_p7 = pnand %p517_p6, %p511_p3 }
  0x10   :  { %521 = shalt.err (!%p518_p7)
}
  0x11   :  { %25 = dma.hbm_to_vmem [thread:$0]  %s694_s0, 128, %s23_s10, [#allocation3]  }
  0x12   :  { %s522_s25 = scalar_lea.hbm %s695_s1, 256 }
  0x13   :  { %p523_p8 = scmp.ne.s32.totalorder %s695_s1, %s522_s25  ;;  %p526_p9 = scmp.lt.u32.totalorder %s522_s25, %s695_s1 }
  0x15   :  { %p528_p10 = pnand %p526_p9, %p523_p8 }
  0x17   :  { %531 = shalt.err (!%p528_p10)
}
  0x18   :  { %s532_s30 = scalar_lea.vmem %s605_s12, 256  ;;  %p537_p12 = scmp.lt.s32.totalorder %s605_s12, %s605_s12 }
  0x19   :  { %p533_p11 = scmp.ne.s32.totalorder %s605_s12, %s532_s30  ;;  %p538_p13 = scmp.lt.s32.totalorder %s532_s30, %s532_s30 }
  0x1b   :  { %p539_p0 = por %p538_p13, %p537_p12 }
  0x1d   :  { %p540_p1 = pnand %p539_p0, %p533_p11 }
  0x1f   :  { %543 = shalt.err (!%p540_p1)
}
  0x20   :  { %s550_s0 = smov 128   ;;  %s551_s10 = smov 8  }
  0x21   :  { %37 = dma.hbm_to_vmem [thread:$0]  %s695_s1, 256, %s605_s12, [#allocation5], %s550_s0, %s550_s0, %s551_s10  }
  0x22   :  { %544 = dma.done.wait [#allocation3], 128  }
  0x23   :  { %545 = vsyncadd [#allocation3], 4294967168 }
  0x24   :  { %546 = dma.done.wait [#allocation5], 256  }
  0x25   :  { %547 = vsyncadd [#allocation5], 4294967040  ;;  %v552_v0 = vmov 0.0|0.0   ;;  %vm553_vm0 = vmmov 0   ;;  %v554_v1 = vmov 0.0   ;;  %v59_v2 = vld [vmem:[#allocation4] sm:$0xff] }
  0x26   :  { %472 = vmatprep.subr.bf16.mxu0 %v552_v0  ;;  %436 = vmatprep.mubr.msk.f32.mxu0 %vm553_vm0, %v554_v1  ;;  %v60_v3 = vld [vmem:[#allocation4 + $0x8] sm:$0xff]  ;;  %v143_v5 = vld [vmem:[%s697_s3] sm:$0xff]  ;;  %v144_v6 = vld [vmem:[%s697_s3 + $0x8] sm:$0xff]  ;;  %vm68_vm1 = vcmask 130048   ;;  %vm154_vm2 = vcmask 261120   ;;  %vm398_vm3 = vcmask 31744  }
  0x27   :  { %475 = vmatprep.subr.bf16.mxu1 %v552_v0  ;;  %447 = vmatprep.mubr.msk.f32.mxu1 %vm553_vm0, %v554_v1  ;;  %v473_v4 = vpack.c.bf16 %v60_v3, %v59_v2  ;;  %v476_v7 = vpack.c.bf16 %v144_v6, %v143_v5  ;;  %v58_v8 = vld [vmem:[#allocation2] sm:$0xff]  ;;  %v145_v9 = vld [vmem:[%s697_s3 + $0x10] sm:$0xff]  ;;  %v146_v10 = vld [vmem:[%s697_s3 + $0x18] sm:$0xff] }
  0x28   :  { %v479_v11 = vpack.c.bf16 %v146_v10, %v145_v9  ;;  %v229_v12 = vld [vmem:[%s699_s5] sm:$0xff]  ;;  %v230_v13 = vld [vmem:[%s699_s5 + $0x8] sm:$0xff]  ;;  %v231_v20 = vld [vmem:[%s699_s5 + $0x10] sm:$0xff] }
  0x29   :  { %474 = vmatpush3.bf16.msra.mxu0 %v473_v4  ;;  %477 = vmatpush3.bf16.msra.mxu1 %v476_v7  ;;  %v482_v14 = vpack.c.bf16 %v230_v13, %v229_v12  ;;  %v406_v15 = vld [vmem:[%s696_s2] ss:$0 sm:$0xff]  ;;  %v232_v21 = vld [vmem:[%s699_s5 + $0x18] sm:$0xff]  ;;  %v315_v24 = vld [vmem:[%s701_s7 + $0x8] sm:$0xff] }
  0x2a   :  { %481 = vmatprep.subr.bf16.mxu0 %v552_v0  ;;  %478 = vmatprep.subr.bf16.mxu1 %v552_v0  ;;  %v485_v22 = vpack.c.bf16 %v232_v21, %v231_v20  ;;  %v314_v23 = vld [vmem:[%s701_s7] sm:$0xff]  ;;  %v316_v31 = vld [vmem:[%s701_s7 + $0x10] sm:$0xff]  ;;  %v317_v32 = vld [vmem:[%s701_s7 + $0x18] sm:$0xff] }
  0x2b   :  { %v488_v25 = vpack.c.bf16 %v315_v24, %v314_v23  ;;  %v408_v26 = vld [vmem:[%s698_s4] ss:$0 sm:$0xff]  ;;  %v491_v33 = vpack.c.bf16 %v317_v32, %v316_v31 }
  0x2c   :  { %437 = vmatmul.mubr.msk.f32.vlgmr.msra.gmra.mrb[0].mxu0 %vm68_vm1, %v58_v8  ;;  %v410_v34 = vld [vmem:[%s700_s6] ss:$0 sm:$0xff] }
  0x2d   :  { %458 = vmatprep.mubr.msk.f32.mxu0 %vm553_vm0, %v554_v1  ;;  %480 = vmatpush3.bf16.msra.mxu1 %v479_v11  ;;  %v412_v39 = vld [vmem:[%s702_s8] ss:$0 sm:$0xff] }
  0x2e   :  { %487 = vmatprep.subr.bf16.mxu1 %v552_v0  ;;  %483 = vmatpush3.bf16.msra.mxu0 %v482_v14 }
  0x2f   :  { %484 = vmatprep.subr.bf16.mxu0 %v552_v0 }
  0x32   :  { %486 = vmatpush3.bf16.msra.mxu0 %v485_v22 }
  0xff   :  { %v138_v16 = vpop.f32.mrb[0].mxu0 }
 0x100   :  { %v139_v17 = vadd.f32 %v406_v15, %v138_v16  ;;  %v438_v18 = vpop.f32.mrb[1].mxu0 }
 0x102   :  { %v142_v19 = vmax.f32 %v139_v17, 0.0 }
 0x104   :  { %448 = vmatmul.mubr.msk.f32.vlgmr.msra.gmra.mrb[0].mxu1 %vm154_vm2, %v142_v19 }
 0x105   :  { %469 = vmatprep.mubr.msk.f32.mxu1 %vm553_vm0, %v554_v1  ;;  %489 = vmatpush3.bf16.msra.mxu1 %v488_v25 }
 0x106   :  { %490 = vmatprep.subr.bf16.mxu1 %v552_v0 }
 0x109   :  { %492 = vmatpush3.bf16.msra.mxu1 %v491_v33 }
 0x1d7   :  { %v224_v27 = vpop.f32.mrb[0].mxu1 }
 0x1d8   :  { %v225_v28 = vadd.f32 %v408_v26, %v224_v27  ;;  %v449_v29 = vpop.f32.mrb[1].mxu1 }
 0x1da   :  { %v228_v30 = vmax.f32 %v225_v28, 0.0 }
 0x1dc   :  { %459 = vmatmul.mubr.msk.f32.vlgmr.msra.gmra.mrb[2].mxu0 %vm154_vm2, %v228_v30 }
 0x2af   :  { %v309_v35 = vpop.f32.mrb[2].mxu0 }
 0x2b0   :  { %v310_v36 = vadd.f32 %v410_v34, %v309_v35  ;;  %v460_v37 = vpop.f32.mrb[3].mxu0 }
 0x2b2   :  { %v313_v38 = vmax.f32 %v310_v36, 0.0 }
 0x2b4   :  { %470 = vmatmul.mubr.msk.f32.vlgmr.msra.gmra.mrb[2].mxu1 %vm154_vm2, %v313_v38 }
 0x387   :  { %v394_v40 = vpop.f32.mrb[2].mxu1 }
 0x388   :  { %v395_v41 = vadd.f32 %v412_v39, %v394_v40  ;;  %v471_v42 = vpop.f32.mrb[3].mxu1 }
 0x38a   :  { %399 = vst.msk [vmem:[%s703_s9] sm:$0xff] %vm398_vm3, %v395_v41 }
 0x38b   :  { %404 = vsyncpa [#allocation3], 1 }
 0x38c   :  { %405 = vsyncpa [#allocation5], 1 }

</bundles_post_ra>
